<compile_context>
chip_gen: v7x
topology: tpu7x:2x2x1
jax: 0.10.0
libtpu: 0.0.40
codegen_flags: <defaults>
</compile_context>

<pallas_src>
from functools import partial

import jax
import jax.numpy as jnp
from jax import lax
from jax.experimental import pallas as pl
from jax.experimental.pallas import tpu as pltpu


def _residual_kernel(x_ref, w3_ref, w1_ref, mask_ref, o_ref, *, W):
    # x_ref:    (B, Cin, H*W)   f32  -- B images of this grid step
    # w3_ref:   (Crh, 9*Cin)    bf16 -- 3x3 weights, tap-major / channel-minor K
    # w1_ref:   (Cout, Crh)     bf16 -- 1x1 weights
    # mask_ref: (9, H*W)        f32  -- precomputed boundary masks per tap
    # o_ref:    (B, Cout, H*W)  f32
    B, C, HW = x_ref.shape

    x = x_ref[...]                          # keep pre-ReLU x for the residual
    h = jnp.maximum(x, 0.0)                 # first ReLU (f32, VPU)
    h2 = h.reshape(B * C, HW)               # free reshape (C % 8 == 0)
    masks = mask_ref[...]                   # (9, HW)

    # im2col: tap (ky,kx) needs h[c, y+ky-1, x+kx-1] (zero outside the image).
    # In the per-image flat layout that is a lane rotation by d = dy*W + dx
    # plus a precomputed boundary mask.
    parts = []
    for ky in range(3):
        for kx in range(3):
            t = ky * 3 + kx
            d = (ky - 1) * W + (kx - 1)
            if d == 0:
                parts.append(h)             # center tap: no shift, no mask
                continue
            shifted = pltpu.roll(h2, shift=(-d) % HW, axis=1)   # XLU
            shifted = shifted * masks[t:t + 1, :]               # VPU mul
            parts.append(shifted.reshape(B, C, HW))
    patch = jnp.concatenate(parts, axis=1)  # (B, 9*Cin, HW), f32

    w3 = w3_ref[...]                        # bf16
    w1 = w1_ref[...]                        # bf16

    # 3x3 conv: one wide-K MXU matmul per image (K = 9*Cin), bf16 operands,
    # f32 accumulation.
    w3b = jnp.broadcast_to(w3[None], (B,) + w3.shape)
    r = jnp.einsum("brk,bkn->brn", w3b, patch.astype(jnp.bfloat16),
                   preferred_element_type=jnp.float32)
    r = jnp.maximum(r, 0.0)                 # second ReLU (f32)

    # 1x1 conv.
    w1b = jnp.broadcast_to(w1[None], (B,) + w1.shape)
    out = jnp.einsum("bor,brn->bon", w1b, r.astype(jnp.bfloat16),
                     preferred_element_type=jnp.float32)

    o_ref[...] = x + out                    # residual add (f32)


def residual_forward(x_nchw, w3_oihw, w1_oihw):
    """x_nchw:  (N, Cin, H, W) float32
       w3_oihw: (Crh, Cin, 3, 3) float32  (PyTorch Conv2d layout, bias=False)
       w1_oihw: (Cout, Crh, 1, 1) float32
       returns (N, Cout, H, W); requires Cout == Cin (residual add)."""
    N, Cin, H, W = x_nchw.shape
    Crh = w3_oihw.shape[0]
    Cout = w1_oihw.shape[0]
    assert Cout == Cin, "residual add requires num_hiddens == in_channels"
    HW = H * W

    # --- channel padding to sublane multiples of 8 (no-op for aligned sizes) --
    cp = (-Cin) % 8
    rp = (-Crh) % 8
    Cin_p, Crh_p, Cout_p = Cin + cp, Crh + rp, Cout + cp

    x_flat = x_nchw.reshape(N, Cin, HW).astype(jnp.float32)
    if cp:
        x_flat = jnp.pad(x_flat, ((0, 0), (0, cp), (0, 0)))

    # OIHW -> (Crh, ky, kx, Cin) -> (Crh, 9*Cin_p): K is tap-major/channel-minor.
    w3m = jnp.transpose(w3_oihw, (0, 2, 3, 1)).astype(jnp.float32)
    if cp:
        w3m = jnp.pad(w3m, ((0, 0), (0, 0), (0, 0), (0, cp)))
    w3m = w3m.reshape(Crh, 9 * Cin_p)
    if rp:
        w3m = jnp.pad(w3m, ((0, rp), (0, 0)))
    w3m = w3m.astype(jnp.bfloat16)

    w1m = w1_oihw.reshape(Cout, Crh).astype(jnp.float32)
    if rp:
        w1m = jnp.pad(w1m, ((0, 0), (0, rp)))
    if cp:
        w1m = jnp.pad(w1m, ((0, cp), (0, 0)))
    w1m = w1m.astype(jnp.bfloat16)

    # --- precomputed per-tap boundary masks, resident across grid steps -------
    pos = jnp.arange(HW, dtype=jnp.int32)
    py = pos // W
    px = pos % W
    mask_rows = []
    for ky in range(3):
        for kx in range(3):
            dy, dx = ky - 1, kx - 1
            m = jnp.ones((HW,), dtype=bool)
            if dy < 0:
                m = m & (py >= -dy)
            if dy > 0:
                m = m & (py < H - dy)
            if dx < 0:
                m = m & (px >= -dx)
            if dx > 0:
                m = m & (px < W - dx)
            mask_rows.append(m)
    masks = jnp.stack(mask_rows, axis=0).astype(jnp.float32)   # (9, HW)

    # --- grid: 2 parallel steps (both v7x TCs; only 2 fixed overheads on
    # single-TC v5e/v6e), batch folded into each block ------------------------
    num_blocks = 2 if N >= 2 else 1
    ipb = pl.cdiv(N, num_blocks)            # images per block
    N_pad = num_blocks * ipb
    if N_pad != N:
        x_flat = jnp.pad(x_flat, ((0, N_pad - N), (0, 0), (0, 0)))

    kernel = partial(_residual_kernel, W=W)

    out_flat = pl.pallas_call(
        kernel,
        out_shape=jax.ShapeDtypeStruct((N_pad, Cout_p, HW), jnp.float32),
        grid_spec=pltpu.PrefetchScalarGridSpec(
            num_scalar_prefetch=0,
            grid=(num_blocks,),
            in_specs=[
                pl.BlockSpec((ipb, Cin_p, HW), lambda n: (n, 0, 0)),
                pl.BlockSpec((Crh_p, 9 * Cin_p), lambda n: (0, 0)),
                pl.BlockSpec((Cout_p, Crh_p), lambda n: (0, 0)),
                pl.BlockSpec((9, HW), lambda n: (0, 0)),
            ],
            out_specs=pl.BlockSpec((ipb, Cout_p, HW), lambda n: (n, 0, 0)),
        ),
        compiler_params=pltpu.CompilerParams(
            dimension_semantics=("parallel",),
        ),
    )(x_flat, w3m, w1m, masks)

    return out_flat[:N, :Cout].reshape(N, Cout, H, W)


def _reference_forward(x_nchw, w3_oihw, w1_oihw):
    """Plain-JAX reference mirroring the PyTorch module (NCHW convs)."""
    h = jnp.maximum(x_nchw, 0.0)
    h = lax.conv_general_dilated(
        h, w3_oihw, window_strides=(1, 1), padding=((1, 1), (1, 1)),
        dimension_numbers=("NCHW", "OIHW", "NCHW"))
    h = jnp.maximum(h, 0.0)
    h = lax.conv_general_dilated(
        h, w1_oihw, window_strides=(1, 1), padding=((0, 0), (0, 0)),
        dimension_numbers=("NCHW", "OIHW", "NCHW"))
    return x_nchw + h


if __name__ == "__main__":
    # Residual(in_channels=8, num_hiddens=8, num_residual_hiddens=16)
    N, Cin, H, W = 2, 8, 16, 16
    num_hiddens = Cin
    num_residual_hiddens = 16

    key = jax.random.PRNGKey(0)
    k_x, k_w3, k_w1 = jax.random.split(key, 3)

    x = jax.random.normal(k_x, (N, Cin, H, W), dtype=jnp.float32)
    w3 = 0.1 * jax.random.normal(
        k_w3, (num_residual_hiddens, Cin, 3, 3), dtype=jnp.float32)
    w1 = 0.1 * jax.random.normal(
        k_w1, (num_hiddens, num_residual_hiddens, 1, 1), dtype=jnp.float32)

    out = residual_forward(x, w3, w1)
    out = jax.block_until_ready(out)

    ref = _reference_forward(x, w3, w1)
    assert out.shape == (N, num_hiddens, H, W)
    # bf16 MXU operands (f32 accumulation) -> relaxed tolerance vs f32 reference.
    assert jnp.allclose(out, ref, atol=2e-2, rtol=2e-2), "mismatch vs reference"

    print("KERNEL_OK")
</pallas_src>

<mosaic_0001>
module attributes {stable_mosaic.version = 11 : i64} {
  func.func @_residual_kernel(%arg0: i32, %arg1: memref<1x8x256xf32, #tpu.memory_space<vmem>>, %arg2: memref<16x72xbf16, #tpu.memory_space<vmem>>, %arg3: memref<8x16xbf16, #tpu.memory_space<vmem>>, %arg4: memref<9x256xf32, #tpu.memory_space<vmem>>, %arg5: memref<1x8x256xf32, #tpu.memory_space<vmem>>) attributes {dimension_semantics = [#tpu.dimension_semantics<parallel>], iteration_bounds = array<i64: 2>, scalar_prefetch = 0 : i64, scratch_operands = 0 : i64, tpu.core_type = #tpu.core_type<tc>, window_params = [{transform_indices = @transform_0, window_bounds = array<i64: 1, 8, 256>}, {pipeline_mode = #tpu.pipeline_mode<synchronous>, transform_indices = @transform_1, window_bounds = array<i64: 16, 72>}, {pipeline_mode = #tpu.pipeline_mode<synchronous>, transform_indices = @transform_2, window_bounds = array<i64: 8, 16>}, {pipeline_mode = #tpu.pipeline_mode<synchronous>, transform_indices = @transform_3, window_bounds = array<i64: 9, 256>}, {transform_indices = @transform_4, window_bounds = array<i64: 1, 8, 256>}]} {
    %c0 = arith.constant 0 : index
    %c0_0 = arith.constant 0 : index
    %c0_1 = arith.constant 0 : index
    %0 = vector.load %arg1[%c0, %c0_0, %c0_1] : memref<1x8x256xf32, #tpu.memory_space<vmem>>, vector<1x8x256xf32>
    %cst = arith.constant 0.000000e+00 : f32
    %1 = vector.broadcast %cst : f32 to vector<1x8x256xf32>
    %2 = arith.maximumf %0, %1 : vector<1x8x256xf32>
    %3 = vector.shape_cast %2 : vector<1x8x256xf32> to vector<8x256xf32>
    %c0_2 = arith.constant 0 : index
    %c0_3 = arith.constant 0 : index
    %4 = vector.load %arg4[%c0_2, %c0_3] : memref<9x256xf32, #tpu.memory_space<vmem>>, vector<9x256xf32>
    %c17_i32 = arith.constant 17 : i32
    %5 = tpu.dynamic_rotate %3 by %c17_i32 dim 1 : vector<8x256xf32>, i32 -> vector<8x256xf32>
    %6 = vector.extract_strided_slice %4 {offsets = [0, 0], sizes = [1, 256], strides = [1, 1]} : vector<9x256xf32> to vector<1x256xf32>
    %7 = vector.broadcast %6 : vector<1x256xf32> to vector<8x256xf32>
    %8 = arith.mulf %5, %7 : vector<8x256xf32>
    %9 = vector.shape_cast %8 : vector<8x256xf32> to vector<1x8x256xf32>
    %c16_i32 = arith.constant 16 : i32
    %10 = tpu.dynamic_rotate %3 by %c16_i32 dim 1 : vector<8x256xf32>, i32 -> vector<8x256xf32>
    %11 = vector.extract_strided_slice %4 {offsets = [1, 0], sizes = [1, 256], strides = [1, 1]} : vector<9x256xf32> to vector<1x256xf32>
    %12 = vector.broadcast %11 : vector<1x256xf32> to vector<8x256xf32>
    %13 = arith.mulf %10, %12 : vector<8x256xf32>
    %14 = vector.shape_cast %13 : vector<8x256xf32> to vector<1x8x256xf32>
    %c15_i32 = arith.constant 15 : i32
    %15 = tpu.dynamic_rotate %3 by %c15_i32 dim 1 : vector<8x256xf32>, i32 -> vector<8x256xf32>
    %16 = vector.extract_strided_slice %4 {offsets = [2, 0], sizes = [1, 256], strides = [1, 1]} : vector<9x256xf32> to vector<1x256xf32>
    %17 = vector.broadcast %16 : vector<1x256xf32> to vector<8x256xf32>
    %18 = arith.mulf %15, %17 : vector<8x256xf32>
    %19 = vector.shape_cast %18 : vector<8x256xf32> to vector<1x8x256xf32>
    %c1_i32 = arith.constant 1 : i32
    %20 = tpu.dynamic_rotate %3 by %c1_i32 dim 1 : vector<8x256xf32>, i32 -> vector<8x256xf32>
    %21 = vector.extract_strided_slice %4 {offsets = [3, 0], sizes = [1, 256], strides = [1, 1]} : vector<9x256xf32> to vector<1x256xf32>
    %22 = vector.broadcast %21 : vector<1x256xf32> to vector<8x256xf32>
    %23 = arith.mulf %20, %22 : vector<8x256xf32>
    %24 = vector.shape_cast %23 : vector<8x256xf32> to vector<1x8x256xf32>
    %c255_i32 = arith.constant 255 : i32
    %25 = tpu.dynamic_rotate %3 by %c255_i32 dim 1 : vector<8x256xf32>, i32 -> vector<8x256xf32>
    %26 = vector.extract_strided_slice %4 {offsets = [5, 0], sizes = [1, 256], strides = [1, 1]} : vector<9x256xf32> to vector<1x256xf32>
    %27 = vector.broadcast %26 : vector<1x256xf32> to vector<8x256xf32>
    %28 = arith.mulf %25, %27 : vector<8x256xf32>
    %29 = vector.shape_cast %28 : vector<8x256xf32> to vector<1x8x256xf32>
    %c241_i32 = arith.constant 241 : i32
    %30 = tpu.dynamic_rotate %3 by %c241_i32 dim 1 : vector<8x256xf32>, i32 -> vector<8x256xf32>
    %31 = vector.extract_strided_slice %4 {offsets = [6, 0], sizes = [1, 256], strides = [1, 1]} : vector<9x256xf32> to vector<1x256xf32>
    %32 = vector.broadcast %31 : vector<1x256xf32> to vector<8x256xf32>
    %33 = arith.mulf %30, %32 : vector<8x256xf32>
    %34 = vector.shape_cast %33 : vector<8x256xf32> to vector<1x8x256xf32>
    %c240_i32 = arith.constant 240 : i32
    %35 = tpu.dynamic_rotate %3 by %c240_i32 dim 1 : vector<8x256xf32>, i32 -> vector<8x256xf32>
    %36 = vector.extract_strided_slice %4 {offsets = [7, 0], sizes = [1, 256], strides = [1, 1]} : vector<9x256xf32> to vector<1x256xf32>
    %37 = vector.broadcast %36 : vector<1x256xf32> to vector<8x256xf32>
    %38 = arith.mulf %35, %37 : vector<8x256xf32>
    %39 = vector.shape_cast %38 : vector<8x256xf32> to vector<1x8x256xf32>
    %c239_i32 = arith.constant 239 : i32
    %40 = tpu.dynamic_rotate %3 by %c239_i32 dim 1 : vector<8x256xf32>, i32 -> vector<8x256xf32>
    %41 = vector.extract_strided_slice %4 {offsets = [8, 0], sizes = [1, 256], strides = [1, 1]} : vector<9x256xf32> to vector<1x256xf32>
    %42 = vector.broadcast %41 : vector<1x256xf32> to vector<8x256xf32>
    %43 = arith.mulf %40, %42 : vector<8x256xf32>
    %44 = vector.shape_cast %43 : vector<8x256xf32> to vector<1x8x256xf32>
    %45 = tpu.concatenate %9, %14, %19, %24, %2, %29, %34, %39, %44 in 1 : vector<1x8x256xf32>, vector<1x8x256xf32>, vector<1x8x256xf32>, vector<1x8x256xf32>, vector<1x8x256xf32>, vector<1x8x256xf32>, vector<1x8x256xf32>, vector<1x8x256xf32>, vector<1x8x256xf32> -> vector<1x72x256xf32>
    %c0_4 = arith.constant 0 : index
    %c0_5 = arith.constant 0 : index
    %46 = vector.load %arg2[%c0_4, %c0_5] : memref<16x72xbf16, #tpu.memory_space<vmem>>, vector<16x72xbf16>
    %c0_6 = arith.constant 0 : index
    %c0_7 = arith.constant 0 : index
    %47 = vector.load %arg3[%c0_6, %c0_7] : memref<8x16xbf16, #tpu.memory_space<vmem>>, vector<8x16xbf16>
    %48 = vector.shape_cast %46 : vector<16x72xbf16> to vector<1x16x72xbf16>
    %49 = arith.truncf %45 : vector<1x72x256xf32> to vector<1x72x256xbf16>
    "tpu.trace_start"() <{level = 10 : i32, message = "brk,bkn->brn"}> : () -> ()
    %cst_8 = arith.constant dense<0.000000e+00> : vector<1x16x256xf32>
    %50 = tpu.matmul %48, %49, %cst_8 {dimension_numbers = #tpu.dot_dimension_numbers<[2], [1], [1], [2], [0, 0, 0, 1, 1, 2], [0], [0]>} : vector<1x16x72xbf16>, vector<1x72x256xbf16>, vector<1x16x256xf32> -> vector<1x16x256xf32>
    "tpu.trace_stop"() : () -> ()
    %cst_9 = arith.constant 0.000000e+00 : f32
    %51 = vector.broadcast %cst_9 : f32 to vector<1x16x256xf32>
    %52 = arith.maximumf %50, %51 : vector<1x16x256xf32>
    %53 = vector.shape_cast %47 : vector<8x16xbf16> to vector<1x8x16xbf16>
    %54 = arith.truncf %52 : vector<1x16x256xf32> to vector<1x16x256xbf16>
    "tpu.trace_start"() <{level = 10 : i32, message = "bor,brn->bon"}> : () -> ()
    %cst_10 = arith.constant dense<0.000000e+00> : vector<1x8x256xf32>
    %55 = tpu.matmul %53, %54, %cst_10 {dimension_numbers = #tpu.dot_dimension_numbers<[2], [1], [1], [2], [0, 0, 0, 1, 1, 2], [0], [0]>} : vector<1x8x16xbf16>, vector<1x16x256xbf16>, vector<1x8x256xf32> -> vector<1x8x256xf32>
    "tpu.trace_stop"() : () -> ()
    %56 = arith.addf %0, %55 : vector<1x8x256xf32>
    %c0_11 = arith.constant 0 : index
    %c0_12 = arith.constant 0 : index
    %c0_13 = arith.constant 0 : index
    %57 = vector.load %arg5[%c0_11, %c0_12, %c0_13] : memref<1x8x256xf32, #tpu.memory_space<vmem>>, vector<1x8x256xf32>
    tpu.vector_store %arg5[%c0_11, %c0_12, %c0_13], %56 {strides = array<i32>} : memref<1x8x256xf32, #tpu.memory_space<vmem>>, vector<1x8x256xf32>,
    return
  }
  func.func @transform_0(%arg0: i32) -> (i32, i32, i32) {
    %c0_i32 = arith.constant 0 : i32
    %c0_i32_0 = arith.constant 0 : i32
    %c0_i32_1 = arith.constant 0 : i32
    return %arg0, %c0_i32, %c0_i32_0 : i32, i32, i32
  }
  func.func @transform_1(%arg0: i32) -> (i32, i32) {
    %c0_i32 = arith.constant 0 : i32
    %c0_i32_0 = arith.constant 0 : i32
    %c0_i32_1 = arith.constant 0 : i32
    return %c0_i32, %c0_i32_0 : i32, i32
  }
  func.func @transform_2(%arg0: i32) -> (i32, i32) {
    %c0_i32 = arith.constant 0 : i32
    %c0_i32_0 = arith.constant 0 : i32
    %c0_i32_1 = arith.constant 0 : i32
    return %c0_i32, %c0_i32_0 : i32, i32
  }
  func.func @transform_3(%arg0: i32) -> (i32, i32) {
    %c0_i32 = arith.constant 0 : i32
    %c0_i32_0 = arith.constant 0 : i32
    %c0_i32_1 = arith.constant 0 : i32
    return %c0_i32, %c0_i32_0 : i32, i32
  }
  func.func @transform_4(%arg0: i32) -> (i32, i32, i32) {
    %c0_i32 = arith.constant 0 : i32
    %c0_i32_0 = arith.constant 0 : i32
    %c0_i32_1 = arith.constant 0 : i32
    return %arg0, %c0_i32, %c0_i32_0 : i32, i32, i32
  }
}

</mosaic_0001>

<bundles_post_ra>
// kernel: tpu_custom_call.1
= control target key start
LH: loop header
LB: loop body
LE: loop exit
PB: predicated region body
PF: predicated region fallthrough
CT: control target
= control target key end

     0   :  { %9 = vsyncpa [#allocation3], 0  ;;  %s1231_s0 = inlined_call_operand.hbm [shape: f32[2,8,256], index: 0, kind: input, shape index: {}]   ;;  %s1232_s1 = inlined_call_operand.hbm [shape: bf16[16,72], index: 1, kind: input, shape index: {}]   ;;  %s1233_s2 = inlined_call_operand.vmem [shape: bf16[8,16], index: 2, kind: input, shape index: {}]   ;;  %s1234_s3 = inlined_call_operand.hbm [shape: f32[9,256], index: 3, kind: input, shape index: {}]   ;;  %s1235_s4 = inlined_call_operand.hbm [shape: f32[2,8,256], index: 4, kind: output, shape index: {}]  }
   0x1   :  { %11 = vsyncpa [#allocation3 + $0x1], 0 }
   0x2   :  { %12 = vsyncpa [#allocation6], 0 }
   0x3   :  { %13 = vsyncpa [#allocation4], 0 }
   0x4   :  { %15 = vsyncpa [#allocation4 + $0x1], 0  ;;  %s928_s15 = smov 0   ;;  %s930_s16 = smov 0  }
   0x5   :  { %s932_s17 = smov 0   ;;  %s934_s18 = smov 0  }
   0x6 LB: > { %s949_s19 = sadd.s32 4294967295, %s884_s18   ;;  %s621_s20 = sadd.s32 4294967294, %s884_s18   ;;  %s884_s18 = sphi %s934_s18, %s1255_s18   ;;  %s880_s17 = sphi %s932_s17, %s1254_s17   ;;  %s876_s16 = sphi %s930_s16, %s1253_s16   ;;  %s872_s15 = sphi %s928_s15, %s1252_s15  }
   0x7   : > { %p41_p0 = scmp.ne.s32.totalorder %s876_s16, %s872_s15  ;;  %p1236_p1 = scmp.eq.s32.totalorder %s949_s19, 0 }
   0x8   : > { %p134_p3 = scmp.eq.s32.totalorder %s621_s20, 1  ;;  %p622_p5 = scmp.ge.s32.totalorder %s884_s18, 1 }
   0x9   : > { %p958_p4 = por %p1236_p1, %p41_p0  ;;  %p141_p7 = scmp.lt.s32.totalorder %s884_s18, 3 }
   0xa   : > { %p963_p6 = por %p134_p3, %p41_p0  ;;  %s886_s24 = smov [#allocation5]  }
   0xb   : > { %s1239_s21 = scalar_select %p958_p4, 1, 0 }
   0xc   : > { %s1240_s22 = scalar_select %p963_p6, 1, 0 }
   0xd   : > { %p968_p8 = pnand %p622_p5, %p141_p7  ;;  %s153_s25 = sshll.u32 %s886_s24, 4  ;;  %s972_s25 = int_to_ptr.vmem [resolvable:$true] %s153_s25 }
   0xe   : > { %s887_s27 = smov [#allocation7]   ;;  %s728_s5 = scalar_lea.hbm %s1232_s1, 128 }
   0xf   : > { %p659_p9 = pneg %p968_p8  ;;  %s169_s28 = sshll.u32 %s887_s27, 4  ;;  %s983_s28 = int_to_ptr.vmem [resolvable:$true] %s169_s28 }
  0x10   : > { %p729_p12 = scmp.ne.s32.totalorder %s1232_s1, %s728_s5  ;;  %p735_p5 = scmp.lt.u32.totalorder %s728_s5, %s1232_s1 }
  0x11   : > { %p979_p11 = pnand %p659_p9, %p1236_p1 }
  0x13   : > { %p730_p13 = pneg %p979_p11 }
  0x15   : > { %p731_p0 = pnand %p730_p13, %p729_p12 }
  0x17   : > { %p732_p3 = pneg %p731_p0 }
  0x19   : > { %p737_p7 = pnand %p735_p5, %p732_p3 }
  0x1b   : > { %740 = shalt.err (!%p737_p7)
}
  0x1c   : > { %s741_s10 = scalar_lea.vmem %s972_s25, 128  ;;  %p749_p2 = scmp.lt.s32.totalorder %s972_s25, %s972_s25 }
  0x1d   : > { %p742_p9 = scmp.ne.s32.totalorder %s972_s25, %s741_s10  ;;  %p750_p12 = scmp.lt.s32.totalorder %s741_s10, %s741_s10 }
  0x1f   : > { %p744_p10 = pnand %p742_p9, %p730_p13  ;;  %p751_p0 = por %p750_p12, %p749_p2 }
  0x21   : > { %p745_p1 = pneg %p744_p10 }
  0x23   : > { %p752_p6 = pnand %p751_p0, %p745_p1 }
  0x25   : > { %755 = shalt.err (!%p752_p6)
}
  0x26   : > { %s888_s11 = smov 64   ;;  %s889_s12 = smov 4  }
  0x27   : > { %662 = dma.hbm_to_vmem [thread:$0]  (!%p979_p11), %s1232_s1, 128, %s972_s25, [#allocation6], %s888_s11, %s888_s11, %s889_s12  }
  0x28   : > { %s756_s27 = scalar_lea.hbm %s1234_s3, 512 }
  0x29   : > { %p757_p2 = scmp.ne.s32.totalorder %s1234_s3, %s756_s27  ;;  %p763_p10 = scmp.lt.u32.totalorder %s756_s27, %s1234_s3 }
  0x2b   : > { %p759_p1 = pnand %p757_p2, %p730_p13 }
  0x2d   : > { %p760_p6 = pneg %p759_p1 }
  0x2f   : > { %p765_p3 = pnand %p763_p10, %p760_p6 }
  0x31   : > { %768 = shalt.err (!%p765_p3)
}
  0x32   : > { %s769_s25 = scalar_lea.vmem %s983_s28, 512  ;;  %p777_p12 = scmp.lt.s32.totalorder %s983_s28, %s983_s28 }
  0x33   : > { %p770_p5 = scmp.ne.s32.totalorder %s983_s28, %s769_s25  ;;  %p778_p0 = scmp.lt.s32.totalorder %s769_s25, %s769_s25 }
  0x35   : > { %p772_p7 = pnand %p770_p5, %p730_p13  ;;  %p779_p2 = por %p778_p0, %p777_p12 }
  0x37   : > { %p773_p9 = pneg %p772_p7 }
  0x39   : > { %p780_p1 = pnand %p779_p2, %p773_p9 }
  0x3b   : > { %783 = shalt.err (!%p780_p1)
}
  0x3c   : > { %s890_s7 = smov 256   ;;  %s891_s8 = smov 16  }
  0x3d   : > { %665 = dma.hbm_to_vmem [thread:$0]  (!%p979_p11), %s1234_s3, 512, %s983_s28, [#allocation6], %s890_s7, %s890_s7, %s891_s8  }
  0x3e   : > { %s1038_s11 = sadd.s32 1, %s884_s18   ;;  %s28_s13 = sadd.s32 1, %s880_s17 }
  0x3f   : > { %s25_s12 = ssub.s32 %s884_s18, %s1038_s11  ;;  %p35_p6 = scmp.ne.s32.totalorder %s880_s17, %s876_s16 }
  0x40   : > { %p26_p13 = scmp.eq.s32.totalorder %s25_s12, 0  ;;  %p36_p10 = scmp.eq.s32.totalorder %s884_s18, 0 }
  0x41   : > { %p1243_p5 = scmp.eq.s32.totalorder %s949_s19, 1  ;;  %p676_p9 = scmp.lt.s32.totalorder %s884_s18, 2 }
  0x42   : > { %s1047_s14 = scalar_select %p26_p13, %s880_s17, %s28_s13  }
  0x43   : > { %p37_p3 = por %p36_p10, %p35_p6  ;;  %p1051_p7 = por %p1243_p5, %p35_p6 }
  0x44   : > { %s183_s26 = sand.u32 1, %s880_s17   ;;  %s645_s28 = sshll.u32 %s884_s18, 8 }
  0x45   : > { %s1244_s20 = scalar_select %p1051_p7, 1, 0 }
  0x46   : > { %s626_s24 = sshll.u32 %s183_s26, 4  ;;  %s1061_s30 = scalar_lea.hbm %s1231_s0, %s645_s28 }
  0x47   : > { %s187_s5 = scalar_lea.vmem [#allocation2], %s626_s24  ;;  %p1065_p11 = pnand %p676_p9, %p37_p3 }
  0x48   : > { %s195_s6 = sshll.u32 %s187_s5, 4  ;;  %s184_s7 = scalar_lea.sflag [#allocation3], %s183_s26  ;;  %s1063_s6 = int_to_ptr.vmem [resolvable:$true] %s195_s6 }
  0x49   : > { %s784_s8 = scalar_lea.hbm %s1061_s30, 256  ;;  %p786_p0 = pneg %p1065_p11 }
  0x4a   : > { %p785_p12 = scmp.ne.s32.totalorder %s1061_s30, %s784_s8  ;;  %s789_s12 = scalar_lea.hbm %s1231_s0, 512 }
  0x4b   : > { %p790_p13 = scmp.lt.u32.totalorder %s1061_s30, %s1231_s0  ;;  %p791_p6 = scmp.lt.u32.totalorder %s789_s12, %s784_s8 }
  0x4c   : > { %p787_p2 = pnand %p786_p0, %p785_p12  ;;  %p793_p3 = scmp.lt.u32.totalorder %s784_s8, %s1061_s30 }
  0x4d   : > { %p792_p10 = por %p791_p6, %p790_p13 }
  0x4e   : > { %p788_p1 = pneg %p787_p2 }
  0x4f   : > { %p794_p5 = por %p793_p3, %p792_p10 }
  0x51   : > { %p795_p9 = pnand %p794_p5, %p788_p1 }
  0x53   : > { %798 = shalt.err (!%p795_p9)
}
  0x54   : > { %s799_s26 = scalar_lea.vmem %s1063_s6, 256  ;;  %s892_s28 = smov [#allocation2]  }
  0x55   : > { %p800_p12 = scmp.ne.s32.totalorder %s1063_s6, %s799_s26  ;;  %s804_s27 = sshll.u32 %s892_s28, 4  ;;  %s805_s27 = int_to_ptr.vmem [resolvable:$false] %s804_s27 }
  0x56   : > { %s806_s29 = scalar_lea.vmem %s805_s27, 512  ;;  %p807_p4 = scmp.lt.s32.totalorder %s1063_s6, %s805_s27 }
  0x57   : > { %p802_p2 = pnand %p800_p12, %p786_p0  ;;  %p808_p13 = scmp.lt.s32.totalorder %s806_s29, %s799_s26 }
  0x59   : > { %p803_p7 = pneg %p802_p2  ;;  %p809_p6 = por %p808_p13, %p807_p4 }
  0x5b   : > { %p810_p10 = pnand %p809_p6, %p803_p7 }
  0x5d   : > { %813 = shalt.err (!%p810_p10)
}
  0x5e   : > { %669 = dma.hbm_to_vmem [thread:$0]  (!%p1065_p11), %s1061_s30, 256, %s1063_s6, %s184_s7  }
  0x5f   : > { %204 = sbr.rel (%p968_p8) target bundleno = 713 (0x2c9), region = 36  ;;  %s1097_s5 = sand.u32 (!%p968_p8), 1, %s876_s16  }
  0x60   : > { %s630_s8 = sshll.u32 (!%p968_p8), %s1097_s5, 4  ;;  %s207_s9 = scalar_lea.sflag (!%p968_p8), [#allocation3], %s1097_s5 }
  0x61   : > { %s210_s10 = scalar_lea.vmem (!%p968_p8), [#allocation2], %s630_s8  ;;  %p1246_p4 = scmp.ne.s32.totalorder (!%p968_p8), %s1239_s21, 0 }
  0x66   : > { %859 = dma.done.wait (%p1246_p4), %s207_s9, 256  }
  0x67   : > { %861 = vsyncadd (%p1246_p4), %s207_s9, 4294967040  ;;  %p1247_p7 = scmp.eq.s32.totalorder %s949_s19, 0 }
  0x69   : > { %863 = dma.done.wait (%p1247_p7), [#allocation6], 640   ;;  %p1248_p8 = pmov %p1247_p7 }
  0x6a   : > { %v1111_v0 = vld [vmem:[%s210_s10] sm:$0xff]  ;;  %v1113_v1 = vld [vmem:[%s210_s10 + $0x8] sm:$0xff]  ;;  %s893_s23 = smov 16   ;;  %s894_s30 = smov 17   ;;  %v899_v4 = vmov 0   ;;  %v256_v5 = vlaneseq  ;;  %vm412_vm8 = vcmask 1043456  }
  0x6b   : > { %865 = vsyncadd (%p1248_p8), [#allocation6], 4294966656  ;;  %v1116_v2 = vmax.f32 %v1111_v0, 0.0  ;;  %v1121_v3 = vmax.f32 %v1113_v1, 0.0  ;;  %s895_s21 = smov 15   ;;  %s896_s6 = smov 1   ;;  %451 = vmatprep.mubr.bf16.mxu0 %v899_v4  ;;  %504 = vmatprep.mubr.bf16.mxu1 %v899_v4 }
  0x6c   : > { %s897_s25 = smov 127   ;;  %s898_s7 = smov 113   ;;  %v1137_v6 = vshrl.u32 %v256_v5, 7  ;;  %v1139_v7 = vand.u32 127, %v256_v5  ;;  %v1143_v10 = vld [vmem:[#allocation7] sm:$0xff]  ;;  %v1145_v11 = vld [vmem:[#allocation7 + $0x8] sm:$0xff] }
  0x6d   : > { %271 = vrot.lane.b32.xlu1 %v1116_v2, %s893_s23  ;;  %252 = vrot.lane.b32.xlu0 %v1116_v2, %s894_s30  ;;  %s900_s12 = smov 112   ;;  %s901_s13 = smov 111   ;;  %vm408_vm9 = vcmask 588800   ;;  %vm468_vm10 = vcmask 130048  }
  0x6e   : > { %v280_v8 = vsub.s32 1, %v1137_v6  ;;  %v263_v9 = vsub.s32 0, %v1137_v6  ;;  %vm275_vm0 = vcmp.lt.s32.totalorder %v1139_v7, 16  ;;  %vm258_vm1 = vcmp.lt.s32.totalorder %v1139_v7, 17  ;;  %s646_s28 = sshll.u32 %s949_s19, 8  ;;  %s242_s27 = scalar_lea.vmem [#allocation8], %s630_s8 }
  0x6f   : > { %v297_v20 = vsub.s32 2, %v1137_v6  ;;  %v314_v21 = vsub.s32 3, %v1137_v6  ;;  %vm292_vm2 = vcmp.lt.s32.totalorder %v1139_v7, 15  ;;  %v331_v35 = vsub.s32 5, %v1137_v6  ;;  %s532_s29 = sshll.u32 %s242_s27, 4  ;;  %s518_s19 = scalar_lea.sflag [#allocation4], %s1097_s5  ;;  %s1189_s29 = int_to_ptr.vmem [resolvable:$true] %s532_s29 }
  0x70   : > { %v281_v14 = vrot.slane %v1143_v10, %v280_v8  ;;  %v264_v15 = vrot.slane %v1143_v10, %v263_v9  ;;  %v268_v16 = vrot.slane %v1145_v11, %v263_v9  ;;  %v285_v17 = vrot.slane %v1145_v11, %v280_v8  ;;  %s814_s8 = scalar_lea.vmem %s1189_s29, 256  ;;  %p1249_p0 = scmp.ne.s32.totalorder %s1244_s20, 0 }
  0x71   : > { %273 = vrot.lane.b32.xlu1 %v1121_v3, %s893_s23  ;;  %254 = vrot.lane.b32.xlu0 %v1121_v3, %s894_s30  ;;  %v298_v34 = vrot.slane %v1143_v10, %v297_v20  ;;  %v302_v36 = vrot.slane %v1145_v11, %v297_v20  ;;  %vm309_vm3 = vcmp.lt.s32.totalorder %v1139_v7, 1  ;;  %v315_v37 = vrot.slane %v1143_v10, %v314_v21  ;;  %v634_v20 = vld [vmem:[#allocation7 + $0x10] ss:$0 sm:$0xff]  ;;  %s1187_s23 = scalar_lea.hbm %s1235_s4, %s646_s28  ;;  %p815_p11 = scmp.ne.s32.totalorder %s1189_s29, %s814_s8 }
  0x72   : > { %v319_v38 = vrot.slane %v1145_v11, %v314_v21  ;;  %vm326_vm4 = vcmp.lt.s32.totalorder %v1139_v7, 127  ;;  %v332_v45 = vrot.slane %v1143_v10, %v331_v35  ;;  %v336_v46 = vrot.slane %v1145_v11, %v331_v35  ;;  %v635_v21 = vld [vmem:[#allocation7 + $0x18] ss:$0 sm:$0xff]  ;;  %s902_s30 = smov [#allocation8]  }
  0x73   : > { %v348_v57 = vsub.s32 6, %v1137_v6  ;;  %v365_v60 = vsub.s32 7, %v1137_v6  ;;  %vm343_vm5 = vcmp.lt.s32.totalorder %v1139_v7, 113  ;;  %vm360_vm6 = vcmp.lt.s32.totalorder %v1139_v7, 112  ;;  %p816_p1 = pnand %p815_p11, %p1249_p0 }
  0x74   : > { %vm377_vm7 = vcmp.lt.s32.totalorder %v1139_v7, 111 }
  0x75   : > { %290 = vrot.lane.b32.xlu1 %v1121_v3, %s895_s21  ;;  %288 = vrot.lane.b32.xlu0 %v1116_v2, %s895_s21  ;;  %v349_v5 = vrot.slane %v1143_v10, %v348_v57  ;;  %v353_v8 = vrot.slane %v1145_v11, %v348_v57  ;;  %v366_v9 = vrot.slane %v1143_v10, %v365_v60  ;;  %p817_p3 = pneg %p816_p1  ;;  %s818_s21 = sshll.u32 %s902_s30, 4  ;;  %s819_s21 = int_to_ptr.vmem [resolvable:$false] %s818_s21 }
  0x76   : > { %v370_v6 = vrot.slane %v1145_v11, %v365_v60  ;;  %p821_p5 = scmp.lt.s32.totalorder %s1189_s29, %s819_s21 }
  0x79   : > { %307 = vrot.lane.b32.xlu1 %v1121_v3, %s896_s6  ;;  %305 = vrot.lane.b32.xlu0 %v1116_v2, %s896_s6  ;;  %s820_s6 = scalar_lea.vmem %s819_s21, 512 }
  0x7a   : > { %p822_p9 = scmp.lt.s32.totalorder %s820_s6, %s814_s8 }
  0x7c   : > { %p823_p12 = por %p822_p9, %p821_p5 }
  0x7d   : > { %324 = vrot.lane.b32.xlu1 %v1121_v3, %s897_s25  ;;  %322 = vrot.lane.b32.xlu0 %v1116_v2, %s897_s25 }
  0x7e   : > { %p824_p2 = pnand %p823_p12, %p817_p3 }
  0x81   : > { %341 = vrot.lane.b32.xlu1 %v1121_v3, %s898_s7  ;;  %339 = vrot.lane.b32.xlu0 %v1116_v2, %s898_s7 }
  0x85   : > { %358 = vrot.lane.b32.xlu1 %v1121_v3, %s900_s12  ;;  %356 = vrot.lane.b32.xlu0 %v1116_v2, %s900_s12 }
  0x89   : > { %375 = vrot.lane.b32.xlu1 %v1121_v3, %s901_s13  ;;  %373 = vrot.lane.b32.xlu0 %v1116_v2, %s901_s13 }
  0xdf   : > { %v272_v12 = vpop.permute.xlu1 %271  ;;  %v253_v13 = vpop.permute.xlu0 %252 }
  0xe3   : > { %v274_v18 = vpop.permute.xlu1 %273  ;;  %v255_v19 = vpop.permute.xlu0 %254 }
  0xe4   : > { %v276_v22 = vsel %vm275_vm0, %v272_v12, %v274_v18  ;;  %v277_v23 = vsel %vm275_vm0, %v274_v18, %v272_v12  ;;  %v259_v24 = vsel %vm258_vm1, %v253_v13, %v255_v19  ;;  %v260_v25 = vsel %vm258_vm1, %v255_v19, %v253_v13 }
  0xe5   : > { %v286_v26 = vmul.f32 %v281_v14, %v277_v23  ;;  %v269_v27 = vmul.f32 %v264_v15, %v260_v25  ;;  %v270_v28 = vmul.f32 %v268_v16, %v259_v24  ;;  %v287_v29 = vmul.f32 %v285_v17, %v276_v22 }
  0xe7   : > { %v291_v30 = vpop.permute.xlu1 %290  ;;  %v289_v31 = vpop.permute.xlu0 %288  ;;  %v394_v32 = vpack.c.bf16 %v287_v29, %v270_v28  ;;  %v393_v33 = vpack.c.bf16 %v286_v26, %v269_v27 }
  0xe8   : > { %v293_v39 = vsel %vm292_vm2, %v289_v31, %v291_v30  ;;  %v294_v40 = vsel %vm292_vm2, %v291_v30, %v289_v31  ;;  %v727_v30 = vld [vmem:[#allocation5] sm:$0xff]  }
  0xe9   : > { %419 = vmatprep.subr.bf16.mxu0 %v394_v32  ;;  %v303_v47 = vmul.f32 %v298_v34, %v294_v40  ;;  %v304_v48 = vmul.f32 %v302_v36, %v293_v39 }
  0xea   : > { %420 = vmatpush1.bf16.msra.mxu0 %v393_v33 }
  0xeb   : > { %v308_v41 = vpop.permute.xlu1 %307  ;;  %v306_v42 = vpop.permute.xlu0 %305 }
  0xec   : > { %v310_v43 = vsel %vm309_vm3, %v306_v42, %v308_v41  ;;  %v311_v44 = vsel %vm309_vm3, %v308_v41, %v306_v42  ;;  %v392_v41 = vld [vmem:[%s1233_s2] sm:$0xf] }
  0xed   : > { %v320_v49 = vmul.f32 %v315_v37, %v311_v44  ;;  %v321_v50 = vmul.f32 %v319_v38, %v310_v43 }
  0xef   : > { %v325_v51 = vpop.permute.xlu1 %324  ;;  %v323_v52 = vpop.permute.xlu0 %322  ;;  %v396_v53 = vpack.c.bf16 %v321_v50, %v304_v48  ;;  %v395_v54 = vpack.c.bf16 %v320_v49, %v303_v47 }
  0xf0   : > { %v327_v55 = vsel %vm326_vm4, %v323_v52, %v325_v51  ;;  %v328_v56 = vsel %vm326_vm4, %v325_v51, %v323_v52 }
  0xf1   : > { %v337_v58 = vmul.f32 %v332_v45, %v327_v55  ;;  %v338_v59 = vmul.f32 %v336_v46, %v328_v56  ;;  %421 = vmatprep.subr.bf16.mxu0 %v396_v53 }
  0xf2   : > { %422 = vmatpush1.bf16.msra.mxu0 %v395_v54 }
  0xf3   : > { %v342_v61 = vpop.permute.xlu1 %341  ;;  %v340_v62 = vpop.permute.xlu0 %339  ;;  %v398_v63 = vpack.c.bf16 %v338_v59, %v1121_v3  ;;  %v397_v4 = vpack.c.bf16 %v337_v58, %v1116_v2 }
  0xf4   : > { %v344_v12 = vsel %vm343_vm5, %v340_v62, %v342_v61  ;;  %v345_v13 = vsel %vm343_vm5, %v342_v61, %v340_v62 }
  0xf5   : > { %423 = vmatprep.subr.bf16.mxu0 %v398_v63  ;;  %v354_v2 = vmul.f32 %v349_v5, %v344_v12  ;;  %v355_v17 = vmul.f32 %v353_v8, %v345_v13 }
  0xf6   : > { %424 = vmatpush1.bf16.msra.mxu0 %v397_v4 }
  0xf7   : > { %v359_v14 = vpop.permute.xlu1 %358  ;;  %v357_v15 = vpop.permute.xlu0 %356 }
  0xf8   : > { %v361_v16 = vsel %vm360_vm6, %v357_v15, %v359_v14  ;;  %v362_v3 = vsel %vm360_vm6, %v359_v14, %v357_v15 }
  0xf9   : > { %v371_v18 = vmul.f32 %v366_v9, %v361_v16  ;;  %v372_v19 = vmul.f32 %v370_v6, %v362_v3 }
  0xfb   : > { %v376_v22 = vpop.permute.xlu1 %375  ;;  %v374_v23 = vpop.permute.xlu0 %373  ;;  %v400_v10 = vpack.c.bf16 %v372_v19, %v355_v17  ;;  %v399_v24 = vpack.c.bf16 %v371_v18, %v354_v2 }
  0xfc   : > { %v378_v11 = vsel %vm377_vm7, %v374_v23, %v376_v22  ;;  %v379_v25 = vsel %vm377_vm7, %v376_v22, %v374_v23 }
  0xfd   : > { %v388_v26 = vmul.f32 %v634_v20, %v378_v11  ;;  %v389_v27 = vmul.f32 %v635_v21, %v379_v25  ;;  %425 = vmatprep.subr.bf16.mxu0 %v400_v10 }
  0xfe   : > { %426 = vmatpush1.bf16.msra.mxu0 %v399_v24 }
  0xff   : > { %v401_v28 = vpack.c.bf16 %v388_v26, %v388_v26  ;;  %v402_v29 = vpack.c.bf16 %v389_v27, %v389_v27 }
 0x101   : > { %637 = vmatprep.subr.msk.bf16.mxu0 %vm412_vm8, %v402_v29  ;;  %v414_v7 = vsel %vm412_vm8, %v401_v28, 0 }
 0x102   : > { %428 = vmatpush1.bf16.msra.mxu0 %v414_v7 }
 0x105   : > { %638 = vmatmul.mubr.msk.bf16.vlgmr.msra.gmra.mrb[0].mxu0 %vm408_vm9, %v727_v30 }
 0x1d8   : > { %v453_v31 = vpop.f32.mrb[0].mxu0 }
 0x1d9   : > { %v455_v32 = vpop.f32.mrb[1].mxu0  ;;  %v462_v34 = vmax.f32 %v453_v31, 0.0 }
 0x1da   : > { %v457_v33 = vpop.f32.mrb[2].mxu0  ;;  %v463_v37 = vmax.f32 %v455_v32, 0.0 }
 0x1db   : > { %v464_v35 = vmax.f32 %v457_v33, 0.0  ;;  %v459_v36 = vpop.f32.mrb[3].mxu0 }
 0x1dc   : > { %v465_v38 = vmax.f32 %v459_v36, 0.0 }
 0x1dd   : > { %v466_v39 = vpack.c.bf16 %v464_v35, %v462_v34 }
 0x1de   : > { %v467_v40 = vpack.c.bf16 %v465_v38, %v463_v37 }
 0x1e0   : > { %472 = vmatprep.subr.bf16.mxu1 %v467_v40 }
 0x1e1   : > { %473 = vmatpush1.bf16.msra.mxu1 %v466_v39 }
 0x1e4   : > { %639 = vmatmul.mubr.msk.bf16.vlgmr.msra.gmra.mrb[0].mxu1 %vm468_vm10, %v392_v41 }
 0x2b7   : > { %v506_v42 = vpop.f32.mrb[0].mxu1 }
 0x2b8   : > { %v513_v43 = vadd.f32 %v506_v42, %v1111_v0  ;;  %v508_v44 = vpop.f32.mrb[1].mxu1 }
 0x2b9   : > { %v514_v45 = vadd.f32 %v508_v44, %v1113_v1  ;;  %v510_v46 = vpop.f32.mrb[2].mxu1 }
 0x2ba   : > { %515 = vst [vmem:[%s242_s27] sm:$0xff] %v513_v43  ;;  %v511_v47 = vpop.f32.mrb[3].mxu1 }
 0x2bb   : > { %516 = vst [vmem:[%s242_s27 + $0x8] sm:$0xff] %v514_v45 }
 0x2bc   : > { %827 = shalt.err (!%p824_p2)
}
 0x2bd   : > { %s828_s5 = scalar_lea.hbm %s1187_s23, 256  ;;  %s832_s12 = scalar_lea.hbm %s1235_s4, 512 }
 0x2be   : > { %p829_p13 = scmp.ne.s32.totalorder %s1187_s23, %s828_s5  ;;  %p833_p4 = scmp.lt.u32.totalorder %s1187_s23, %s1235_s4 }
 0x2bf   : > { %p834_p7 = scmp.lt.u32.totalorder %s832_s12, %s828_s5  ;;  %p836_p11 = scmp.lt.u32.totalorder %s828_s5, %s1187_s23 }
 0x2c0   : > { %p830_p6 = pnand %p829_p13, %p1249_p0 }
 0x2c1   : > { %p835_p8 = por %p834_p7, %p833_p4 }
 0x2c2   : > { %p831_p10 = pneg %p830_p6 }
 0x2c3   : > { %p837_p1 = por %p836_p11, %p835_p8 }
 0x2c5   : > { %p838_p3 = pnand %p837_p1, %p831_p10 }
 0x2c7   : > { %841 = shalt.err (!%p838_p3)
}
 0x2c8   : > { %657 = dma.vmem_to_hbm [thread:$0]  (%p1249_p0), %s1189_s29, 256, %s1187_s23, %s518_s19  }
 0x2c9 PF: > { %s544_s26 = sand.u32 1, %s872_s15   ;;  %p1250_p5 = scmp.ne.s32.totalorder %s1240_s22, 0 }
 0x2ca   : > { %p1251_p9 = scmp.ge.s32.totalorder %s884_s18, 2  ;;  %s545_s28 = scalar_lea.sflag [#allocation4], %s544_s26 }
 0x2cc   : > { %p671_p12 = pnand %p1251_p9, %p1250_p5 }
 0x2ce   : > { %867 = dma.done.wait (!%p671_p12), %s545_s28, 256  }
 0x2cf   : > { %869 = vsyncadd (!%p671_p12), %s545_s28, 4294967040  ;;  %p18_p2 = scmp.ge.s32.totalorder %s1038_s11, 4   ;;  %s1252_s15 = smov %s876_s16 }
 0x2d0   : > { %s1253_s16 = smov %s880_s17  ;;  %s1254_s17 = smov %s1047_s14 }
 0x2d1   : > { %s1255_s18 = smov %s1038_s11  ;;  %20 = sbr.rel (!%p18_p2) target bundleno = 6 (0x6), region = 89 }
 0x2d8   :  { %550 = vsyncpa [#allocation3], 1 }
 0x2d9   :  { %552 = vsyncpa [#allocation3 + $0x1], 1 }
 0x2da   :  { %553 = vsyncpa [#allocation6], 1 }
 0x2db   :  { %554 = vsyncpa [#allocation4], 1 }
 0x2dc   :  { %556 = vsyncpa [#allocation4 + $0x1], 1 }

</bundles_post_ra>
